<compile_context>
chip_gen: v6e
topology: v6e:2x2x1
jax: 0.10.0
libtpu: 0.0.40
codegen_flags: <defaults>
</compile_context>

<pallas_src>
import math

import jax
import jax.numpy as jnp
from jax import lax
from jax.experimental import pallas as pl
from jax.experimental.pallas import tpu as pltpu


MXU_DTYPE = jnp.bfloat16          # MXU operand / HBM-intermediate dtype
_MASK_VALUE = -1e30               # large finite negative (avoids inf-inf NaNs)
_VMEM_LIMIT = 48 * 1024 * 1024    # <= 48 MiB: safe on v5e/v6e (128 MiB) and v7x (64 MiB/TC)


def _tile(dim, target, align):
    """Largest block size <= target that divides `dim` and is a multiple of
    `align`; the full dim is always legal (full-extent blocks)."""
    if dim <= target:
        return dim
    t = (target // align) * align
    while t >= align:
        if dim % t == 0:
            return t
        t -= align
    return dim


# ----------------------------------------------------------------------------
# RoPE tables (faithful to the PyTorch module: bf16 table math, emb =
# cat(freqs, freqs) frequency layout combined with the interleaved rotate_half).
# Stored bf16, lane-dense (T, C), with the sin table pre-masked/signed for the
# even/odd lane swizzle:
#   out[2i]   = x[2i]   * cos[2i]   - x[2i+1] * sin[2i]
#   out[2i+1] = x[2i+1] * cos[2i+1] + x[2i]   * sin[2i+1]
# ----------------------------------------------------------------------------
def build_rope_tables(seq_len, n_head, head_dim):
    ar = jnp.arange(0, head_dim, 2, dtype=jnp.float32).astype(jnp.bfloat16)
    inv_freq = 1.0 / (10000.0 ** (ar / head_dim))                 # (D/2,) bf16
    t = jnp.arange(seq_len, dtype=jnp.float32).astype(jnp.bfloat16)
    freqs = t[:, None] * inv_freq[None, :]                        # (T, D/2) bf16
    emb = jnp.concatenate([freqs, freqs], axis=-1)                # (T, D) bf16
    cos = jnp.cos(emb)                                            # bf16
    sin = jnp.sin(emb)
    cos_c = jnp.tile(cos, (1, n_head))                            # (T, C) bf16
    sin_c = jnp.tile(sin, (1, n_head))
    lane = jnp.arange(n_head * head_dim)
    is_even = (lane % 2) == 0
    # sin_prev multiplies x[c-1]; sin_next multiplies x[c+1]
    sin_prev = jnp.where(is_even, 0.0, sin_c).astype(jnp.bfloat16)
    sin_next = jnp.where(is_even, -sin_c, 0.0).astype(jnp.bfloat16)
    return cos_c, sin_prev, sin_next


def _rope_swizzle(x, cos, sin_prev, sin_next):
    # Interleaved RoPE on lane-dense f32 data.  Shifted-in columns land where
    # the pre-masked sin tables are zero (tile widths are even and pairs never
    # cross head/tile boundaries), so plain shifts are exact.
    # (pltpu.roll could replace the concatenates; this now runs only once per
    #  projection output tile, so it is off the hot path.)
    zeros = jnp.zeros((x.shape[0], 1), x.dtype)
    x_prev = jnp.concatenate([zeros, x[:, :-1]], axis=1)
    x_next = jnp.concatenate([x[:, 1:], zeros], axis=1)
    return x * cos + x_prev * sin_prev + x_next * sin_next


# ----------------------------------------------------------------------------
# Fused QKV projection with RoPE + q-scale in the finalize.
#   q = RoPE(x @ Wq + bq) / sqrt(D),  k = RoPE(x @ Wk + bk),  v = x @ Wv + bv
# ----------------------------------------------------------------------------
def _make_qkv_rope_kernel(q_scale):
    def kernel(x_ref, wq_ref, wk_ref, wv_ref, bq_ref, bk_ref, bv_ref,
               cos_ref, sinp_ref, sinn_ref,
               q_ref, k_ref, v_ref,
               accq_ref, acck_ref, accv_ref):
        @pl.when(pl.program_id(2) == 0)
        def _init():
            accq_ref[...] = jnp.zeros_like(accq_ref)
            acck_ref[...] = jnp.zeros_like(acck_ref)
            accv_ref[...] = jnp.zeros_like(accv_ref)

        xb = x_ref[...]                                           # (tm, tk) bf16
        accq_ref[...] += jnp.dot(xb, wq_ref[...],
                                 preferred_element_type=jnp.float32)
        acck_ref[...] += jnp.dot(xb, wk_ref[...],
                                 preferred_element_type=jnp.float32)
        accv_ref[...] += jnp.dot(xb, wv_ref[...],
                                 preferred_element_type=jnp.float32)

        @pl.when(pl.program_id(2) == pl.num_programs(2) - 1)
        def _finalize():
            cos = cos_ref[...].astype(jnp.float32)
            sinp = sinp_ref[...].astype(jnp.float32)
            sinn = sinn_ref[...].astype(jnp.float32)
            q_lin = accq_ref[...] + bq_ref[...]
            k_lin = acck_ref[...] + bk_ref[...]
            q_rot = _rope_swizzle(q_lin, cos, sinp, sinn) * q_scale
            k_rot = _rope_swizzle(k_lin, cos, sinp, sinn)
            q_ref[...] = q_rot.astype(q_ref.dtype)
            k_ref[...] = k_rot.astype(k_ref.dtype)
            v_ref[...] = (accv_ref[...] + bv_ref[...]).astype(v_ref.dtype)

    return kernel


def qkv_projection(x2d, w_qkv, bq, bk, bv, rope_tables, seq_len, head_dim, *,
                   tm_target=256, tn_target=256, tk_target=512):
    M, K = x2d.shape
    _, K2, C = w_qkv.shape
    assert K2 == K
    cos_c, sin_prev, sin_next = rope_tables

    # tm must divide T so each row tile sits at a fixed sequence offset
    # (rope row-block index = i % (T // tm)).
    tm = _tile(seq_len, tm_target, 8)
    tk = _tile(K, tk_target, 128)
    tn = _tile(C, tn_target, 128)
    assert seq_len % tm == 0 and M % tm == 0 and K % tk == 0 and C % tn == 0
    rope_blocks = seq_len // tm
    grid = (M // tm, C // tn, K // tk)                            # reduction last

    x_spec = pl.BlockSpec((tm, tk), lambda i, j, k: (i, k))

    def w_spec(s):  # s selects the q/k/v slab of the (3, C, C) weight
        return pl.BlockSpec((None, tk, tn), lambda i, j, k: (s, k, j))

    b_spec = pl.BlockSpec((1, tn), lambda i, j, k: (0, j))
    # rope block index is constant across k => fetched once per (i, j)
    rope_spec = pl.BlockSpec((tm, tn), lambda i, j, k: (i % rope_blocks, j))
    out_spec = pl.BlockSpec((tm, tn), lambda i, j, k: (i, j))

    out_shape = jax.ShapeDtypeStruct((M, C), MXU_DTYPE)
    q_scale = 1.0 / math.sqrt(head_dim)

    return pl.pallas_call(
        _make_qkv_rope_kernel(q_scale),
        out_shape=(out_shape, out_shape, out_shape),
        grid_spec=pltpu.PrefetchScalarGridSpec(
            num_scalar_prefetch=0,
            grid=grid,
            in_specs=[x_spec, w_spec(0), w_spec(1), w_spec(2),
                      b_spec, b_spec, b_spec,
                      rope_spec, rope_spec, rope_spec],
            out_specs=(out_spec, out_spec, out_spec),
            scratch_shapes=[pltpu.VMEM((tm, tn), jnp.float32),
                            pltpu.VMEM((tm, tn), jnp.float32),
                            pltpu.VMEM((tm, tn), jnp.float32)],
        ),
        compiler_params=pltpu.CompilerParams(
            dimension_semantics=("parallel", "parallel", "arbitrary"),
            vmem_limit_bytes=_VMEM_LIMIT,
        ),
    )(x2d, w_qkv, w_qkv, w_qkv, bq, bk, bv, cos_c, sin_prev, sin_next)


# ----------------------------------------------------------------------------
# Flash-style causal attention, head-batched, bf16 in/out, lane-dense (B, T, C).
# q is already RoPE'd and pre-scaled by 1/sqrt(D); k is already RoPE'd.
# ----------------------------------------------------------------------------
def _make_flash_attn_kernel(n_head, head_dim, tq, tkv):
    def kernel(q_ref, k_ref, v_ref, o_ref, m_ref, l_ref, acc_ref, qh_ref):
        qi = pl.program_id(1)
        ki = pl.program_id(2)

        @pl.when(ki == 0)
        def _init():
            m_ref[...] = jnp.full(m_ref.shape, -jnp.inf, dtype=m_ref.dtype)
            l_ref[...] = jnp.zeros_like(l_ref)
            acc_ref[...] = jnp.zeros_like(acc_ref)
            # Re-layout the resident q tile to (n_head, tq, D) once per q block.
            q = q_ref[...]                                        # (tq, C) bf16
            for h in range(n_head):
                qh_ref[h] = q[:, h * head_dim:(h + 1) * head_dim]

        q_first = qi * tq
        q_last = q_first + tq - 1
        k_first = ki * tkv
        k_last = k_first + tkv - 1
        visible = k_first <= q_last        # tile has >= 1 unmasked entry
        fully_visible = k_last <= q_first  # tile entirely below the diagonal

        def process(apply_mask):
            k = k_ref[...]                                        # (tkv, C) bf16
            v = v_ref[...]
            # Single re-layout per KV step, then head-batched matmuls.
            kh = jnp.stack([k[:, h * head_dim:(h + 1) * head_dim]
                            for h in range(n_head)], axis=0)      # (H, tkv, D)
            vh = jnp.stack([v[:, h * head_dim:(h + 1) * head_dim]
                            for h in range(n_head)], axis=0)
            s = jnp.einsum('hqd,hkd->hqk', qh_ref[...], kh,
                           preferred_element_type=jnp.float32)    # (H, tq, tkv)
            if apply_mask:   # only emitted for diagonal-straddling tiles
                row = q_first + lax.broadcasted_iota(jnp.int32, (tq, tkv), 0)
                col = k_first + lax.broadcasted_iota(jnp.int32, (tq, tkv), 1)
                s = jnp.where((col <= row)[None, :, :], s, _MASK_VALUE)
            m_prev = m_ref[...]                                   # (H, tq, 1)
            m_new = jnp.maximum(m_prev, jnp.max(s, axis=-1, keepdims=True))
            alpha = jnp.exp(m_prev - m_new)
            p = jnp.exp(s - m_new)                                # (H, tq, tkv)
            l_ref[...] = alpha * l_ref[...] + jnp.sum(p, axis=-1, keepdims=True)
            pv = jnp.einsum('hqk,hkd->hqd', p.astype(MXU_DTYPE), vh,
                            preferred_element_type=jnp.float32)   # (H, tq, D)
            acc_ref[...] = alpha * acc_ref[...] + pv
            m_ref[...] = m_new

        @pl.when(fully_visible)
        def _no_mask():
            process(apply_mask=False)

        @pl.when(jnp.logical_and(visible, jnp.logical_not(fully_visible)))
        def _diagonal():
            process(apply_mask=True)

        @pl.when(ki == pl.num_programs(2) - 1)
        def _finalize():
            inv_l = pl.reciprocal(l_ref[...], approx=True)        # (H, tq, 1)
            out = acc_ref[...] * inv_l                            # (H, tq, D) f32
            # single lane-dense (tq, C) store
            o_ref[...] = jnp.concatenate(
                [out[h] for h in range(n_head)], axis=-1).astype(o_ref.dtype)

    return kernel


def flash_attention(q, k, v, n_head, *, tq_target=256, tkv_target=256):
    B, T, C = q.shape
    assert C % n_head == 0
    head_dim = C // n_head
    tq = _tile(T, tq_target, 8)
    tkv = _tile(T, tkv_target, 8)
    assert T % tq == 0 and T % tkv == 0
    grid = (B, T // tq, T // tkv)

    def kv_index_map(b, qi, ki):
        # Clamp fully-masked (above-diagonal) KV blocks to the last visible
        # block: repeated block index => Pallas skips the DMA for those steps.
        last_visible = (qi * tq + tq - 1) // tkv
        return (b, jnp.minimum(ki, last_visible), 0)

    q_spec = pl.BlockSpec((None, tq, C), lambda b, qi, ki: (b, qi, 0))
    kv_spec = pl.BlockSpec((None, tkv, C), kv_index_map)
    # TODO(synk): on v5e, if profiling shows exposed KV DMA, switch kv_spec to
    #   pl.BlockSpec((None, tkv, C), kv_index_map, pipeline_mode=pl.Buffered(3))

    return pl.pallas_call(
        _make_flash_attn_kernel(n_head, head_dim, tq, tkv),
        out_shape=jax.ShapeDtypeStruct((B, T, C), MXU_DTYPE),
        grid_spec=pltpu.PrefetchScalarGridSpec(
            num_scalar_prefetch=0,
            grid=grid,
            in_specs=[q_spec, kv_spec, kv_spec],
            out_specs=pl.BlockSpec((None, tq, C), lambda b, qi, ki: (b, qi, 0)),
            scratch_shapes=[
                pltpu.VMEM((n_head, tq, 1), jnp.float32),          # running max
                pltpu.VMEM((n_head, tq, 1), jnp.float32),          # running denom
                pltpu.VMEM((n_head, tq, head_dim), jnp.float32),   # output acc
                pltpu.VMEM((n_head, tq, head_dim), MXU_DTYPE),     # head-major q
            ],
        ),
        compiler_params=pltpu.CompilerParams(
            dimension_semantics=("parallel", "parallel", "arbitrary"),
            vmem_limit_bytes=_VMEM_LIMIT,
        ),
    )(q, k, v)


# ----------------------------------------------------------------------------
# Generic tiled linear for c_proj:  y = x @ W + b   (W stored (in, out))
# ----------------------------------------------------------------------------
def _linear_kernel(x_ref, w_ref, b_ref, o_ref, acc_ref):
    @pl.when(pl.program_id(2) == 0)
    def _init():
        acc_ref[...] = jnp.zeros_like(acc_ref)

    acc_ref[...] += jnp.dot(x_ref[...], w_ref[...],
                            preferred_element_type=jnp.float32)

    @pl.when(pl.program_id(2) == pl.num_programs(2) - 1)
    def _finalize():
        o_ref[...] = (acc_ref[...] + b_ref[...]).astype(o_ref.dtype)


def linear_pallas(x2d, w, b2d, *, out_dtype=jnp.float32,
                  tm_target=256, tn_target=256, tk_target=512):
    M, K = x2d.shape
    K2, N = w.shape
    assert K == K2
    tm = _tile(M, tm_target, 8)
    tk = _tile(K, tk_target, 128)
    tn = _tile(N, tn_target, 128)
    assert M % tm == 0 and K % tk == 0 and N % tn == 0
    grid = (M // tm, N // tn, K // tk)
    return pl.pallas_call(
        _linear_kernel,
        out_shape=jax.ShapeDtypeStruct((M, N), out_dtype),
        grid_spec=pltpu.PrefetchScalarGridSpec(
            num_scalar_prefetch=0,
            grid=grid,
            in_specs=[pl.BlockSpec((tm, tk), lambda i, j, k: (i, k)),
                      pl.BlockSpec((tk, tn), lambda i, j, k: (k, j)),
                      pl.BlockSpec((1, tn), lambda i, j, k: (0, j))],
            out_specs=pl.BlockSpec((tm, tn), lambda i, j, k: (i, j)),
            scratch_shapes=[pltpu.VMEM((tm, tn), jnp.float32)],
        ),
        compiler_params=pltpu.CompilerParams(
            dimension_semantics=("parallel", "parallel", "arbitrary"),
            vmem_limit_bytes=_VMEM_LIMIT,
        ),
    )(x2d, w, b2d)


# ----------------------------------------------------------------------------
# Parameter prep (one-time, init-level): re-layout c_attn weight to (3, C, C)
# and cast weights to bf16 so the forward pass never slices/copies weights.
# ----------------------------------------------------------------------------
def prepare_params(w_attn, b_attn, w_proj, b_proj, n_embd):
    C = n_embd
    w_qkv = w_attn.reshape(C, 3, C).transpose(1, 0, 2).astype(MXU_DTYPE)  # (3,C,C)
    return dict(
        w_qkv=w_qkv,
        bq=b_attn[:C].reshape(1, C).astype(jnp.float32),
        bk=b_attn[C:2 * C].reshape(1, C).astype(jnp.float32),
        bv=b_attn[2 * C:].reshape(1, C).astype(jnp.float32),
        w_proj=w_proj.astype(MXU_DTYPE),
        b_proj=b_proj.reshape(1, C).astype(jnp.float32),
    )


# ----------------------------------------------------------------------------
# Full forward pass (attention_mask=None, use_cache=False path of the module)
# ----------------------------------------------------------------------------
def causal_self_attention(x, params, n_head):
    B, T, C = x.shape
    assert C % n_head == 0
    head_dim = C // n_head
    assert head_dim % 2 == 0 and T % 8 == 0

    x2d = x.reshape(B * T, C).astype(MXU_DTYPE)
    rope_tables = build_rope_tables(T, n_head, head_dim)

    # Fused QKV projection: RoPE + q-scale folded into the finalize; bf16 outs.
    q, k, v = qkv_projection(x2d, params["w_qkv"], params["bq"], params["bk"],
                             params["bv"], rope_tables, T, head_dim)
    q = q.reshape(B, T, C)
    k = k.reshape(B, T, C)
    v = v.reshape(B, T, C)

    # Flash attention with causal masking / causal DMA skip; bf16 lane-dense out.
    y = flash_attention(q, k, v, n_head)

    # Output projection (f32 result, matching the PyTorch module dtype).
    y = linear_pallas(y.reshape(B * T, C), params["w_proj"], params["b_proj"],
                      out_dtype=jnp.float32)
    return y.reshape(B, T, C)


# ----------------------------------------------------------------------------
if __name__ == "__main__":
    # Small config consistent with the module: n_embd % n_head == 0
    B, T = 2, 8
    n_embd, n_head = 32, 2

    key = jax.random.PRNGKey(0)
    k1, k2, k3, k4, k5 = jax.random.split(key, 5)

    # Deterministic synthetic parameters (weights stored as (in, out))
    w_attn = jax.random.normal(k1, (n_embd, 3 * n_embd), jnp.float32) * 0.02
    b_attn = jax.random.normal(k2, (3 * n_embd,), jnp.float32) * 0.02
    w_proj = jax.random.normal(k3, (n_embd, n_embd), jnp.float32) * 0.02
    b_proj = jax.random.normal(k4, (n_embd,), jnp.float32) * 0.02

    x = jax.random.normal(k5, (B, T, n_embd), jnp.float32)

    params = prepare_params(w_attn, b_attn, w_proj, b_proj, n_embd)
    y = causal_self_attention(x, params, n_head)
    jax.block_until_ready(y)

    assert y.shape == (B, T, n_embd) and y.dtype == jnp.float32
    assert bool(jnp.all(jnp.isfinite(y)))
    print("KERNEL_OK")
</pallas_src>

<mosaic_0001>
module attributes {stable_mosaic.version = 11 : i64} {
  func.func @kernel(%arg0: i32, %arg1: i32, %arg2: i32, %arg3: memref<8x32xbf16, #tpu.memory_space<vmem>>, %arg4: memref<1x32x32xbf16, #tpu.memory_space<vmem>>, %arg5: memref<1x32x32xbf16, #tpu.memory_space<vmem>>, %arg6: memref<1x32x32xbf16, #tpu.memory_space<vmem>>, %arg7: memref<1x32xf32, #tpu.memory_space<vmem>>, %arg8: memref<1x32xf32, #tpu.memory_space<vmem>>, %arg9: memref<1x32xf32, #tpu.memory_space<vmem>>, %arg10: memref<8x32xbf16, #tpu.memory_space<vmem>>, %arg11: memref<8x32xbf16, #tpu.memory_space<vmem>>, %arg12: memref<8x32xbf16, #tpu.memory_space<vmem>>, %arg13: memref<8x32xbf16, #tpu.memory_space<vmem>>, %arg14: memref<8x32xbf16, #tpu.memory_space<vmem>>, %arg15: memref<8x32xbf16, #tpu.memory_space<vmem>>, %arg16: memref<8x32xf32, #tpu.memory_space<vmem>>, %arg17: memref<8x32xf32, #tpu.memory_space<vmem>>, %arg18: memref<8x32xf32, #tpu.memory_space<vmem>>) attributes {dimension_semantics = [#tpu.dimension_semantics<parallel>, #tpu.dimension_semantics<parallel>, #tpu.dimension_semantics<arbitrary>], iteration_bounds = array<i64: 2, 1, 1>, scalar_prefetch = 0 : i64, scratch_operands = 3 : i64, tpu.core_type = #tpu.core_type<tc>, window_params = [{transform_indices = @transform_0, window_bounds = array<i64: 8, 32>}, {transform_indices = @transform_1, window_bounds = array<i64: 1, 32, 32>}, {transform_indices = @transform_2, window_bounds = array<i64: 1, 32, 32>}, {transform_indices = @transform_3, window_bounds = array<i64: 1, 32, 32>}, {transform_indices = @transform_4, window_bounds = array<i64: 1, 32>}, {transform_indices = @transform_5, window_bounds = array<i64: 1, 32>}, {transform_indices = @transform_6, window_bounds = array<i64: 1, 32>}, {transform_indices = @transform_7, window_bounds = array<i64: 8, 32>}, {transform_indices = @transform_8, window_bounds = array<i64: 8, 32>}, {transform_indices = @transform_9, window_bounds = array<i64: 8, 32>}, {transform_indices = @transform_10, window_bounds = array<i64: 8, 32>}, {transform_indices = @transform_11, window_bounds = array<i64: 8, 32>}, {transform_indices = @transform_12, window_bounds = array<i64: 8, 32>}]} {
    %c0_i32 = arith.constant 0 : i32
    %0 = arith.cmpi eq, %arg2, %c0_i32 : i32
    %1 = arith.extui %0 : i1 to i32
    %c0_i32_0 = arith.constant 0 : i32
    %2 = arith.cmpi ne, %1, %c0_i32_0 : i32
    scf.if %2 {
      %cst_27 = arith.constant 0.000000e+00 : f32
      %25 = vector.broadcast %cst_27 : f32 to vector<8x32xf32>
      %c0_28 = arith.constant 0 : index
      %c0_29 = arith.constant 0 : index
      %26 = vector.load %arg16[%c0_28, %c0_29] : memref<8x32xf32, #tpu.memory_space<vmem>>, vector<8x32xf32>
      tpu.vector_store %arg16[%c0_28, %c0_29], %25 {strides = array<i32>} : memref<8x32xf32, #tpu.memory_space<vmem>>, vector<8x32xf32>,
      %cst_30 = arith.constant 0.000000e+00 : f32
      %27 = vector.broadcast %cst_30 : f32 to vector<8x32xf32>
      %c0_31 = arith.constant 0 : index
      %c0_32 = arith.constant 0 : index
      %28 = vector.load %arg17[%c0_31, %c0_32] : memref<8x32xf32, #tpu.memory_space<vmem>>, vector<8x32xf32>
      tpu.vector_store %arg17[%c0_31, %c0_32], %27 {strides = array<i32>} : memref<8x32xf32, #tpu.memory_space<vmem>>, vector<8x32xf32>,
      %cst_33 = arith.constant 0.000000e+00 : f32
      %29 = vector.broadcast %cst_33 : f32 to vector<8x32xf32>
      %c0_34 = arith.constant 0 : index
      %c0_35 = arith.constant 0 : index
      %30 = vector.load %arg18[%c0_34, %c0_35] : memref<8x32xf32, #tpu.memory_space<vmem>>, vector<8x32xf32>
      tpu.vector_store %arg18[%c0_34, %c0_35], %29 {strides = array<i32>} : memref<8x32xf32, #tpu.memory_space<vmem>>, vector<8x32xf32>,
    } else {
    }
    %c0 = arith.constant 0 : index
    %c0_1 = arith.constant 0 : index
    %3 = vector.load %arg3[%c0, %c0_1] : memref<8x32xbf16, #tpu.memory_space<vmem>>, vector<8x32xbf16>
    %c0_2 = arith.constant 0 : index
    %c0_3 = arith.constant 0 : index
    %4 = vector.load %arg16[%c0_2, %c0_3] : memref<8x32xf32, #tpu.memory_space<vmem>>, vector<8x32xf32>
    %c0_4 = arith.constant 0 : index
    %c0_5 = arith.constant 0 : index
    %c0_6 = arith.constant 0 : index
    %5 = vector.load %arg4[%c0_4, %c0_5, %c0_6] : memref<1x32x32xbf16, #tpu.memory_space<vmem>>, vector<1x32x32xbf16>
    %6 = vector.shape_cast %5 : vector<1x32x32xbf16> to vector<32x32xbf16>
    %cst = arith.constant dense<0.000000e+00> : vector<8x32xf32>
    %7 = tpu.matmul %3, %6, %cst {dimension_numbers = #tpu.dot_dimension_numbers<[1], [0], [0], [1], [0, 0, 1, 1], [], []>} : vector<8x32xbf16>, vector<32x32xbf16>, vector<8x32xf32> -> vector<8x32xf32>
    %8 = arith.addf %4, %7 : vector<8x32xf32>
    %c0_7 = arith.constant 0 : index
    %c0_8 = arith.constant 0 : index
    %9 = vector.load %arg16[%c0_7, %c0_8] : memref<8x32xf32, #tpu.memory_space<vmem>>, vector<8x32xf32>
    tpu.vector_store %arg16[%c0_7, %c0_8], %8 {strides = array<i32>} : memref<8x32xf32, #tpu.memory_space<vmem>>, vector<8x32xf32>,
    %c0_9 = arith.constant 0 : index
    %c0_10 = arith.constant 0 : index
    %10 = vector.load %arg17[%c0_9, %c0_10] : memref<8x32xf32, #tpu.memory_space<vmem>>, vector<8x32xf32>
    %c0_11 = arith.constant 0 : index
    %c0_12 = arith.constant 0 : index
    %c0_13 = arith.constant 0 : index
    %11 = vector.load %arg5[%c0_11, %c0_12, %c0_13] : memref<1x32x32xbf16, #tpu.memory_space<vmem>>, vector<1x32x32xbf16>
    %12 = vector.shape_cast %11 : vector<1x32x32xbf16> to vector<32x32xbf16>
    %cst_14 = arith.constant dense<0.000000e+00> : vector<8x32xf32>
    %13 = tpu.matmul %3, %12, %cst_14 {dimension_numbers = #tpu.dot_dimension_numbers<[1], [0], [0], [1], [0, 0, 1, 1], [], []>} : vector<8x32xbf16>, vector<32x32xbf16>, vector<8x32xf32> -> vector<8x32xf32>
    %14 = arith.addf %10, %13 : vector<8x32xf32>
    %c0_15 = arith.constant 0 : index
    %c0_16 = arith.constant 0 : index
    %15 = vector.load %arg17[%c0_15, %c0_16] : memref<8x32xf32, #tpu.memory_space<vmem>>, vector<8x32xf32>
    tpu.vector_store %arg17[%c0_15, %c0_16], %14 {strides = array<i32>} : memref<8x32xf32, #tpu.memory_space<vmem>>, vector<8x32xf32>,
    %c0_17 = arith.constant 0 : index
    %c0_18 = arith.constant 0 : index
    %16 = vector.load %arg18[%c0_17, %c0_18] : memref<8x32xf32, #tpu.memory_space<vmem>>, vector<8x32xf32>
    %c0_19 = arith.constant 0 : index
    %c0_20 = arith.constant 0 : index
    %c0_21 = arith.constant 0 : index
    %17 = vector.load %arg6[%c0_19, %c0_20, %c0_21] : memref<1x32x32xbf16, #tpu.memory_space<vmem>>, vector<1x32x32xbf16>
    %18 = vector.shape_cast %17 : vector<1x32x32xbf16> to vector<32x32xbf16>
    %cst_22 = arith.constant dense<0.000000e+00> : vector<8x32xf32>
    %19 = tpu.matmul %3, %18, %cst_22 {dimension_numbers = #tpu.dot_dimension_numbers<[1], [0], [0], [1], [0, 0, 1, 1], [], []>} : vector<8x32xbf16>, vector<32x32xbf16>, vector<8x32xf32> -> vector<8x32xf32>
    %20 = arith.addf %16, %19 : vector<8x32xf32>
    %c0_23 = arith.constant 0 : index
    %c0_24 = arith.constant 0 : index
    %21 = vector.load %arg18[%c0_23, %c0_24] : memref<8x32xf32, #tpu.memory_space<vmem>>, vector<8x32xf32>
    tpu.vector_store %arg18[%c0_23, %c0_24], %20 {strides = array<i32>} : memref<8x32xf32, #tpu.memory_space<vmem>>, vector<8x32xf32>,
    %c0_i32_25 = arith.constant 0 : i32
    %22 = arith.cmpi eq, %arg2, %c0_i32_25 : i32
    %23 = arith.extui %22 : i1 to i32
    %c0_i32_26 = arith.constant 0 : i32
    %24 = arith.cmpi ne, %23, %c0_i32_26 : i32
    scf.if %24 {
      %c0_27 = arith.constant 0 : index
      %c0_28 = arith.constant 0 : index
      %25 = vector.load %arg10[%c0_27, %c0_28] : memref<8x32xbf16, #tpu.memory_space<vmem>>, vector<8x32xbf16>
      %26 = arith.extf %25 : vector<8x32xbf16> to vector<8x32xf32>
      %c0_29 = arith.constant 0 : index
      %c0_30 = arith.constant 0 : index
      %27 = vector.load %arg11[%c0_29, %c0_30] : memref<8x32xbf16, #tpu.memory_space<vmem>>, vector<8x32xbf16>
      %28 = arith.extf %27 : vector<8x32xbf16> to vector<8x32xf32>
      %c0_31 = arith.constant 0 : index
      %c0_32 = arith.constant 0 : index
      %29 = vector.load %arg12[%c0_31, %c0_32] : memref<8x32xbf16, #tpu.memory_space<vmem>>, vector<8x32xbf16>
      %30 = arith.extf %29 : vector<8x32xbf16> to vector<8x32xf32>
      %c0_33 = arith.constant 0 : index
      %c0_34 = arith.constant 0 : index
      %31 = vector.load %arg16[%c0_33, %c0_34] : memref<8x32xf32, #tpu.memory_space<vmem>>, vector<8x32xf32>
      %c0_35 = arith.constant 0 : index
      %c0_36 = arith.constant 0 : index
      %32 = vector.load %arg7[%c0_35, %c0_36] : memref<1x32xf32, #tpu.memory_space<vmem>>, vector<1x32xf32>
      %33 = vector.broadcast %32 : vector<1x32xf32> to vector<8x32xf32>
      %34 = arith.addf %31, %33 : vector<8x32xf32>
      %c0_37 = arith.constant 0 : index
      %c0_38 = arith.constant 0 : index
      %35 = vector.load %arg17[%c0_37, %c0_38] : memref<8x32xf32, #tpu.memory_space<vmem>>, vector<8x32xf32>
      %c0_39 = arith.constant 0 : index
      %c0_40 = arith.constant 0 : index
      %36 = vector.load %arg8[%c0_39, %c0_40] : memref<1x32xf32, #tpu.memory_space<vmem>>, vector<1x32xf32>
      %37 = vector.broadcast %36 : vector<1x32xf32> to vector<8x32xf32>
      %38 = arith.addf %35, %37 : vector<8x32xf32>
      %cst_41 = arith.constant 0.000000e+00 : f32
      %39 = vector.broadcast %cst_41 : f32 to vector<8x1xf32>
      %40 = vector.extract_strided_slice %34 {offsets = [0, 0], sizes = [8, 31], strides = [1, 1]} : vector<8x32xf32> to vector<8x31xf32>
      %41 = tpu.concatenate %39, %40 in 1 : vector<8x1xf32>, vector<8x31xf32> -> vector<8x32xf32>
      %42 = vector.extract_strided_slice %34 {offsets = [0, 1], sizes = [8, 31], strides = [1, 1]} : vector<8x32xf32> to vector<8x31xf32>
      %43 = tpu.concatenate %42, %39 in 1 : vector<8x31xf32>, vector<8x1xf32> -> vector<8x32xf32>
      %44 = arith.mulf %34, %26 : vector<8x32xf32>
      %45 = arith.mulf %41, %28 : vector<8x32xf32>
      %46 = arith.addf %44, %45 : vector<8x32xf32>
      %47 = arith.mulf %43, %30 : vector<8x32xf32>
      %48 = arith.addf %46, %47 : vector<8x32xf32>
      %cst_42 = arith.constant 2.500000e-01 : f32
      %49 = vector.broadcast %cst_42 : f32 to vector<8x32xf32>
      %50 = arith.mulf %48, %49 : vector<8x32xf32>
      %cst_43 = arith.constant 0.000000e+00 : f32
      %51 = vector.broadcast %cst_43 : f32 to vector<8x1xf32>
      %52 = vector.extract_strided_slice %38 {offsets = [0, 0], sizes = [8, 31], strides = [1, 1]} : vector<8x32xf32> to vector<8x31xf32>
      %53 = tpu.concatenate %51, %52 in 1 : vector<8x1xf32>, vector<8x31xf32> -> vector<8x32xf32>
      %54 = vector.extract_strided_slice %38 {offsets = [0, 1], sizes = [8, 31], strides = [1, 1]} : vector<8x32xf32> to vector<8x31xf32>
      %55 = tpu.concatenate %54, %51 in 1 : vector<8x31xf32>, vector<8x1xf32> -> vector<8x32xf32>
      %56 = arith.mulf %38, %26 : vector<8x32xf32>
      %57 = arith.mulf %53, %28 : vector<8x32xf32>
      %58 = arith.addf %56, %57 : vector<8x32xf32>
      %59 = arith.mulf %55, %30 : vector<8x32xf32>
      %60 = arith.addf %58, %59 : vector<8x32xf32>
      %61 = arith.truncf %50 : vector<8x32xf32> to vector<8x32xbf16>
      %c0_44 = arith.constant 0 : index
      %c0_45 = arith.constant 0 : index
      %62 = vector.load %arg13[%c0_44, %c0_45] : memref<8x32xbf16, #tpu.memory_space<vmem>>, vector<8x32xbf16>
      tpu.vector_store %arg13[%c0_44, %c0_45], %61 {strides = array<i32>} : memref<8x32xbf16, #tpu.memory_space<vmem>>, vector<8x32xbf16>,
      %63 = arith.truncf %60 : vector<8x32xf32> to vector<8x32xbf16>
      %c0_46 = arith.constant 0 : index
      %c0_47 = arith.constant 0 : index
      %64 = vector.load %arg14[%c0_46, %c0_47] : memref<8x32xbf16, #tpu.memory_space<vmem>>, vector<8x32xbf16>
      tpu.vector_store %arg14[%c0_46, %c0_47], %63 {strides = array<i32>} : memref<8x32xbf16, #tpu.memory_space<vmem>>, vector<8x32xbf16>,
      %c0_48 = arith.constant 0 : index
      %c0_49 = arith.constant 0 : index
      %65 = vector.load %arg18[%c0_48, %c0_49] : memref<8x32xf32, #tpu.memory_space<vmem>>, vector<8x32xf32>
      %c0_50 = arith.constant 0 : index
      %c0_51 = arith.constant 0 : index
      %66 = vector.load %arg9[%c0_50, %c0_51] : memref<1x32xf32, #tpu.memory_space<vmem>>, vector<1x32xf32>
      %67 = vector.broadcast %66 : vector<1x32xf32> to vector<8x32xf32>
      %68 = arith.addf %65, %67 : vector<8x32xf32>
      %69 = arith.truncf %68 : vector<8x32xf32> to vector<8x32xbf16>
      %c0_52 = arith.constant 0 : index
      %c0_53 = arith.constant 0 : index
      %70 = vector.load %arg15[%c0_52, %c0_53] : memref<8x32xbf16, #tpu.memory_space<vmem>>, vector<8x32xbf16>
      tpu.vector_store %arg15[%c0_52, %c0_53], %69 {strides = array<i32>} : memref<8x32xbf16, #tpu.memory_space<vmem>>, vector<8x32xbf16>,
    } else {
    }
    return
  }
  func.func @transform_0(%arg0: i32, %arg1: i32, %arg2: i32) -> (i32, i32) {
    %c0_i32 = arith.constant 0 : i32
    return %arg0, %arg2 : i32, i32
  }
  func.func @transform_1(%arg0: i32, %arg1: i32, %arg2: i32) -> (i32, i32, i32) {
    %c0_i32 = arith.constant 0 : i32
    %c0_i32_0 = arith.constant 0 : i32
    return %c0_i32, %arg2, %arg1 : i32, i32, i32
  }
  func.func @transform_2(%arg0: i32, %arg1: i32, %arg2: i32) -> (i32, i32, i32) {
    %c1_i32 = arith.constant 1 : i32
    %c0_i32 = arith.constant 0 : i32
    return %c1_i32, %arg2, %arg1 : i32, i32, i32
  }
  func.func @transform_3(%arg0: i32, %arg1: i32, %arg2: i32) -> (i32, i32, i32) {
    %c2_i32 = arith.constant 2 : i32
    %c0_i32 = arith.constant 0 : i32
    return %c2_i32, %arg2, %arg1 : i32, i32, i32
  }
  func.func @transform_4(%arg0: i32, %arg1: i32, %arg2: i32) -> (i32, i32) {
    %c0_i32 = arith.constant 0 : i32
    %c0_i32_0 = arith.constant 0 : i32
    return %c0_i32, %arg1 : i32, i32
  }
  func.func @transform_5(%arg0: i32, %arg1: i32, %arg2: i32) -> (i32, i32) {
    %c0_i32 = arith.constant 0 : i32
    %c0_i32_0 = arith.constant 0 : i32
    return %c0_i32, %arg1 : i32, i32
  }
  func.func @transform_6(%arg0: i32, %arg1: i32, %arg2: i32) -> (i32, i32) {
    %c0_i32 = arith.constant 0 : i32
    %c0_i32_0 = arith.constant 0 : i32
    return %c0_i32, %arg1 : i32, i32
  }
  func.func @transform_7(%arg0: i32, %arg1: i32, %arg2: i32) -> (i32, i32) {
    %c1_i32 = arith.constant 1 : i32
    %c0_i32 = arith.constant 0 : i32
    %0 = arith.cmpi eq, %c1_i32, %c0_i32 : i32
    %c1_i32_0 = arith.constant 1 : i32
    %1 = arith.select %0, %c1_i32_0, %c1_i32 : i32
    %2 = arith.remsi %arg0, %1 : i32
    %c0_i32_1 = arith.constant 0 : i32
    %3 = arith.cmpi ne, %2, %c0_i32_1 : i32
    %c0_i32_2 = arith.constant 0 : i32
    %4 = arith.cmpi slt, %2, %c0_i32_2 : i32
    %c0_i32_3 = arith.constant 0 : i32
    %5 = arith.cmpi slt, %1, %c0_i32_3 : i32
    %6 = arith.xori %4, %5 : i1
    %7 = arith.andi %6, %3 : i1
    %8 = arith.addi %2, %1 : i32
    %9 = arith.select %7, %8, %2 : i32
    %c0_i32_4 = arith.constant 0 : i32
    return %9, %arg1 : i32, i32
  }
  func.func @transform_8(%arg0: i32, %arg1: i32, %arg2: i32) -> (i32, i32) {
    %c1_i32 = arith.constant 1 : i32
    %c0_i32 = arith.constant 0 : i32
    %0 = arith.cmpi eq, %c1_i32, %c0_i32 : i32
    %c1_i32_0 = arith.constant 1 : i32
    %1 = arith.select %0, %c1_i32_0, %c1_i32 : i32
    %2 = arith.remsi %arg0, %1 : i32
    %c0_i32_1 = arith.constant 0 : i32
    %3 = arith.cmpi ne, %2, %c0_i32_1 : i32
    %c0_i32_2 = arith.constant 0 : i32
    %4 = arith.cmpi slt, %2, %c0_i32_2 : i32
    %c0_i32_3 = arith.constant 0 : i32
    %5 = arith.cmpi slt, %1, %c0_i32_3 : i32
    %6 = arith.xori %4, %5 : i1
    %7 = arith.andi %6, %3 : i1
    %8 = arith.addi %2, %1 : i32
    %9 = arith.select %7, %8, %2 : i32
    %c0_i32_4 = arith.constant 0 : i32
    return %9, %arg1 : i32, i32
  }
  func.func @transform_9(%arg0: i32, %arg1: i32, %arg2: i32) -> (i32, i32) {
    %c1_i32 = arith.constant 1 : i32
    %c0_i32 = arith.constant 0 : i32
    %0 = arith.cmpi eq, %c1_i32, %c0_i32 : i32
    %c1_i32_0 = arith.constant 1 : i32
    %1 = arith.select %0, %c1_i32_0, %c1_i32 : i32
    %2 = arith.remsi %arg0, %1 : i32
    %c0_i32_1 = arith.constant 0 : i32
    %3 = arith.cmpi ne, %2, %c0_i32_1 : i32
    %c0_i32_2 = arith.constant 0 : i32
    %4 = arith.cmpi slt, %2, %c0_i32_2 : i32
    %c0_i32_3 = arith.constant 0 : i32
    %5 = arith.cmpi slt, %1, %c0_i32_3 : i32
    %6 = arith.xori %4, %5 : i1
    %7 = arith.andi %6, %3 : i1
    %8 = arith.addi %2, %1 : i32
    %9 = arith.select %7, %8, %2 : i32
    %c0_i32_4 = arith.constant 0 : i32
    return %9, %arg1 : i32, i32
  }
  func.func @transform_10(%arg0: i32, %arg1: i32, %arg2: i32) -> (i32, i32) {
    %c0_i32 = arith.constant 0 : i32
    return %arg0, %arg1 : i32, i32
  }
  func.func @transform_11(%arg0: i32, %arg1: i32, %arg2: i32) -> (i32, i32) {
    %c0_i32 = arith.constant 0 : i32
    return %arg0, %arg1 : i32, i32
  }
  func.func @transform_12(%arg0: i32, %arg1: i32, %arg2: i32) -> (i32, i32) {
    %c0_i32 = arith.constant 0 : i32
    return %arg0, %arg1 : i32, i32
  }
}

</mosaic_0001>

<bundles_post_ra>
// kernel: tpu_custom_call.1
= control target key start
LH: loop header
LB: loop body
LE: loop exit
PB: predicated region body
PF: predicated region fallthrough
CT: control target
= control target key end

     0   :  { %s2239_s0 = inlined_call_operand.hbm [shape: bf16[16,32], index: 0, kind: input, shape index: {}]   ;;  %s2240_s1 = inlined_call_operand.hbm [shape: bf16[3,32,32], index: 1, kind: input, shape index: {}]   ;;  %s2241_s2 = inlined_call_operand.hbm [shape: bf16[3,32,32], index: 2, kind: input, shape index: {}]   ;;  %s2242_s3 = inlined_call_operand.hbm [shape: bf16[3,32,32], index: 3, kind: input, shape index: {}]   ;;  %s2243_s4 = inlined_call_operand.hbm [shape: f32[1,32], index: 4, kind: input, shape index: {}]   ;;  %s2244_s5 = inlined_call_operand.hbm [shape: f32[1,32], index: 5, kind: input, shape index: {}]   ;;  %s2245_s6 = inlined_call_operand.hbm [shape: f32[1,32], index: 6, kind: input, shape index: {}]   ;;  %s2246_s7 = inlined_call_operand.vmem [shape: bf16[8,32], index: 7, kind: input, shape index: {}]   ;;  %s2247_s8 = inlined_call_operand.vmem [shape: bf16[8,32], index: 8, kind: input, shape index: {}]   ;;  %s2248_s9 = inlined_call_operand.vmem [shape: bf16[8,32], index: 9, kind: input, shape index: {}]   ;;  %s2249_s10 = inlined_call_operand.hbm [shape: bf16[16,32], index: 10, kind: output, shape index: {0}]   ;;  %s2250_s11 = inlined_call_operand.hbm [shape: bf16[16,32], index: 11, kind: output, shape index: {1}]   ;;  %s2251_s12 = inlined_call_operand.hbm [shape: bf16[16,32], index: 12, kind: output, shape index: {2}]  }
   0x1   :  { %2258 = sst [smem:[#allocation28_spill]] %s2239_s0 }
   0x2   :  { %2259 = sst [smem:[#allocation29_spill]] %s2240_s1 }
   0x3   :  { %2260 = sst [smem:[#allocation30_spill]] %s2241_s2 }
   0x4   :  { %2261 = sst [smem:[#allocation31_spill]] %s2242_s3 }
   0x5   :  { %2262 = sst [smem:[#allocation32_spill]] %s2243_s4 }
   0x6   :  { %2263 = sst [smem:[#allocation33_spill]] %s2244_s5 }
   0x7   :  { %2264 = sst [smem:[#allocation34_spill]] %s2245_s6 }
   0x8   :  { %2265 = sst [smem:[#allocation35_spill]] %s2246_s7 }
   0x9   :  { %2266 = sst [smem:[#allocation36_spill]] %s2247_s8 }
   0xa   :  { %2267 = sst [smem:[#allocation37_spill]] %s2249_s10 }
   0xb   :  { %2268 = sst [smem:[#allocation38_spill]] %s2250_s11 }
   0xc   :  { %2269 = sst [smem:[#allocation39_spill]] %s2251_s12 }
   0xd   :  { %18 = vsyncpa [#allocation6], 0 }
   0xe   :  { %20 = vsyncpa [#allocation6 + $0x1], 0 }
   0xf   :  { %21 = vsyncpa [#allocation9], 0 }
  0x10   :  { %22 = vsyncpa [#allocation12], 0 }
  0x11   :  { %23 = vsyncpa [#allocation15], 0 }
  0x12   :  { %24 = vsyncpa [#allocation7], 0 }
  0x13   :  { %26 = vsyncpa [#allocation7 + $0x1], 0 }
  0x14   :  { %27 = vsyncpa [#allocation19], 0 }
  0x15   :  { %29 = vsyncpa [#allocation19 + $0x1], 0  ;;  %s1897_s21 = smov 0   ;;  %s1899_s22 = smov 0  }
  0x16   :  { %s1901_s23 = smov 0   ;;  %s1903_s24 = smov 0  }
  0x17   :  { %s1905_s25 = smov 0   ;;  %s1907_s26 = smov 0  }
  0x18 LB: > { %2270 = sst [smem:[#allocation27_spill]] %s1806_s24  ;;  %s1928_s27 = sadd.s32 4294967295, %s1814_s26   ;;  %s1814_s26 = sphi %s1907_s26, %s35_s26   ;;  %s1810_s25 = sphi %s1905_s25, %s2307_s25   ;;  %s1806_s24 = sphi %s1903_s24, %s2306_s24   ;;  %s1802_s23 = sphi %s1901_s23, %s2305_s23   ;;  %s1798_s22 = sphi %s1899_s22, %s2304_s22   ;;  %s1794_s21 = sphi %s1897_s21, %s2303_s21  }
  0x19   : > { %p1254_p0 = scmp.ge.s32.totalorder %s1814_s26, 1  ;;  %p2256_p1 = scmp.eq.s32.totalorder %s1928_s27, 0 }
  0x1a   : > { %p411_p2 = scmp.lt.s32.totalorder %s1814_s26, 3  ;;  %s1816_s29 = smov [#allocation8]  }
  0x1b   : > { %s427_s30 = sshll.u32 %s1816_s29, 4  ;;  %s2272_s3 = sld [smem:[#allocation31_spill]]  ;;  %s428_s30 = int_to_ptr.vmem [resolvable:$true] %s427_s30 }
  0x1c   : > { %p1933_p3 = pnand %p1254_p0, %p411_p2  ;;  %s1817_s17 = smov [#allocation11]  }
  0x1d   : > { %s463_s18 = sshll.u32 %s1817_s17, 4  ;;  %s1487_s20 = scalar_lea.vmem %s428_s30, 256  ;;  %s464_s18 = int_to_ptr.vmem [resolvable:$true] %s463_s18 }
  0x1e   : > { %p1363_p4 = pneg %p1933_p3  ;;  %p1488_p8 = scmp.ne.s32.totalorder %s428_s30, %s1487_s20 }
  0x1f   : > { %p1495_p11 = scmp.lt.s32.totalorder %s428_s30, %s428_s30  ;;  %p1496_p12 = scmp.lt.s32.totalorder %s1487_s20, %s1487_s20 }
  0x20   : > { %p1945_p6 = pnand %p1363_p4, %p2256_p1 }
  0x21   : > { %p1497_p13 = por %p1496_p12, %p1495_p11 }
  0x22   : > { %p1951_p7 = pneg %p1945_p6 }
  0x24   : > { %p1490_p9 = pnand %p1488_p8, %p1951_p7 }
  0x26   : > { %p1491_p10 = pneg %p1490_p9 }
  0x28   : > { %p1498_p0 = pnand %p1497_p13, %p1491_p10 }
  0x2a   : > { %1501 = shalt.err (!%p1498_p0)
}
  0x2b   : > { %s1818_s29 = smov 64   ;;  %s1819_s13 = smov 4  }
  0x2c   : > { %s2275_s1 = sld [smem:[#allocation29_spill]]  ;;  %s1515_s15 = scalar_lea.vmem %s464_s18, 256 }
  0x2d   : > { %p1516_p2 = scmp.ne.s32.totalorder %s464_s18, %s1515_s15  ;;  %p1523_p9 = scmp.lt.s32.totalorder %s464_s18, %s464_s18 }
  0x2e   : > { %p1524_p10 = scmp.lt.s32.totalorder %s1515_s15, %s1515_s15 }
  0x2f   : > { %p1518_p4 = pnand %p1516_p2, %p1951_p7 }
  0x30   : > { %p1525_p11 = por %p1524_p10, %p1523_p9 }
  0x31   : > { %p1519_p8 = pneg %p1518_p4 }
  0x32   : > { %1366 = dma.hbm_to_vmem [thread:$0]  (!%p1945_p6), %s2275_s1, 256, %s428_s30, [#allocation9], %s1818_s29, %s1818_s29, %s1819_s13  }
  0x33   : > { %p1526_p12 = pnand %p1525_p11, %p1519_p8 }
  0x35   : > { %1529 = shalt.err (!%p1526_p12)
}
  0x36   : > { %s2276_s14 = scalar_lea.hbm %s2272_s3, 512  ;;  %s1820_s30 = smov [#allocation14]  }
  0x37   : > { %1372 = dma.hbm_to_vmem [thread:$0]  (!%p1945_p6), %s2276_s14, 256, %s464_s18, [#allocation12], %s1818_s29, %s1818_s29, %s1819_s13  }
  0x38   : > { %s492_s17 = sshll.u32 %s1820_s30, 4  ;;  %s2277_s2 = sld [smem:[#allocation30_spill]]  ;;  %s493_s17 = int_to_ptr.vmem [resolvable:$true] %s492_s17 }
  0x39   : > { %s1542_s10 = scalar_lea.vmem %s493_s17, 16  ;;  %s1549_s24 = scalar_lea.vmem %s493_s17, 32 }
  0x3a   : > { %p1543_p13 = scmp.ne.s32.totalorder %s493_s17, %s1542_s10  ;;  %p1550_p4 = scmp.lt.s32.totalorder %s493_s17, %s493_s17 }
  0x3b   : > { %p1551_p8 = scmp.lt.s32.totalorder %s1549_s24, %s1542_s10 }
  0x3c   : > { %p1545_p0 = pnand %p1543_p13, %p1951_p7 }
  0x3d   : > { %p1552_p9 = por %p1551_p8, %p1550_p4 }
  0x3e   : > { %s1040_s15 = scalar_lea.hbm %s2277_s2, 256  ;;  %p1546_p2 = pneg %p1545_p0 }
  0x40   : > { %p1553_p10 = pnand %p1552_p9, %p1546_p2 }
  0x42   : > { %1556 = shalt.err (!%p1553_p10)
}
  0x43   : > { %s2278_s5 = sld [smem:[#allocation33_spill]]  ;;  %s1821_s1 = smov [#allocation10]  }
  0x44   : > { %s445_s11 = sshll.u32 %s1821_s1, 4  ;;  %s1822_s20 = smov [#allocation13]   ;;  %s446_s11 = int_to_ptr.vmem [resolvable:$true] %s445_s11 }
  0x45   : > { %s479_s14 = sshll.u32 %s1822_s20, 4  ;;  %s1570_s30 = scalar_lea.vmem %s446_s11, 256  ;;  %s480_s14 = int_to_ptr.vmem [resolvable:$true] %s479_s14 }
  0x46   : > { %p1571_p11 = scmp.ne.s32.totalorder %s446_s11, %s1570_s30  ;;  %p1578_p0 = scmp.lt.s32.totalorder %s446_s11, %s446_s11 }
  0x47   : > { %p1579_p2 = scmp.lt.s32.totalorder %s1570_s30, %s1570_s30 }
  0x48   : > { %p1573_p12 = pnand %p1571_p11, %p1951_p7 }
  0x49   : > { %1378 = dma.hbm_to_vmem [thread:$0]  (!%p1945_p6), %s2278_s5, 16, %s493_s17, [#allocation15]  }
  0x4a   : > { %p1574_p13 = pneg %p1573_p12  ;;  %p1580_p4 = por %p1579_p2, %p1578_p0 }
  0x4c   : > { %p1581_p8 = pnand %p1580_p4, %p1574_p13 }
  0x4e   : > { %1584 = shalt.err (!%p1581_p8)
}
  0x4f   : > { %1369 = dma.hbm_to_vmem [thread:$0]  (!%p1945_p6), %s1040_s15, 256, %s446_s11, [#allocation9], %s1818_s29, %s1818_s29, %s1819_s13  }
  0x50   : > { %s1597_s17 = scalar_lea.vmem %s480_s14, 16  ;;  %s1604_s12 = scalar_lea.vmem %s480_s14, 32 }
  0x51   : > { %p1598_p9 = scmp.ne.s32.totalorder %s480_s14, %s1597_s17  ;;  %p1605_p12 = scmp.lt.s32.totalorder %s480_s14, %s480_s14 }
  0x52   : > { %p1606_p13 = scmp.lt.s32.totalorder %s1604_s12, %s1597_s17 }
  0x53   : > { %p1600_p10 = pnand %p1598_p9, %p1951_p7 }
  0x54   : > { %p1607_p0 = por %p1606_p13, %p1605_p12 }
  0x55   : > { %p1601_p11 = pneg %p1600_p10 }
  0x57   : > { %p1608_p2 = pnand %p1607_p0, %p1601_p11 }
  0x59   : > { %1611 = shalt.err (!%p1608_p2)
}
  0x5a   : > { %s2279_s4 = sld [smem:[#allocation32_spill]]  ;;  %s1823_s29 = smov [#allocation16]  }
  0x5b   : > { %s505_s13 = sshll.u32 %s1823_s29, 4  ;;  %s506_s13 = int_to_ptr.vmem [resolvable:$true] %s505_s13 }
  0x5c   : > { %s1623_s15 = scalar_lea.vmem %s506_s13, 16  ;;  %s1630_s11 = scalar_lea.vmem %s506_s13, 32 }
  0x5d   : > { %p1624_p4 = scmp.ne.s32.totalorder %s506_s13, %s1623_s15  ;;  %p1631_p10 = scmp.lt.s32.totalorder %s506_s13, %s506_s13 }
  0x5e   : > { %p1632_p12 = scmp.lt.s32.totalorder %s1630_s11, %s1623_s15 }
  0x5f   : > { %p1626_p8 = pnand %p1624_p4, %p1951_p7 }
  0x60   : > { %1375 = dma.hbm_to_vmem [thread:$0]  (!%p1945_p6), %s2279_s4, 16, %s480_s14, [#allocation12]  }
  0x61   : > { %p1627_p9 = pneg %p1626_p8  ;;  %p1633_p11 = por %p1632_p12, %p1631_p10 }
  0x63   : > { %p1634_p13 = pnand %p1633_p11, %p1627_p9 }
  0x65   : > { %1637 = shalt.err (!%p1634_p13)
}
  0x66   : > { %s2280_s6 = sld [smem:[#allocation34_spill]]  ;;  %s2255_s19 = sadd.s32 4294967294, %s1814_s26  }
  0x67   : > { %s54_s14 = sadd.s32 1, %s1810_s25  ;;  %s63_s16 = sadd.s32 1, %s1802_s23 }
  0x68   : > { %p56_p7 = scmp.ge.s32.totalorder %s54_s14, 2  ;;  %p70_p0 = scmp.ne.s32.totalorder %s1802_s23, %s1798_s22 }
  0x69   : > { %p71_p2 = scmp.eq.s32.totalorder %s1814_s26, 0  ;;  %p76_p8 = scmp.ne.s32.totalorder %s1798_s22, %s1794_s21 }
  0x6a   : > { %s2309_s14 = smov (%p56_p7, %s54_s14), 0  ;;  %p348_p11 = scmp.eq.s32.totalorder %s2255_s19, 1 }
  0x6b   : > { %p2019_p4 = por %p71_p2, %p70_p0  ;;  %s58_s24 = ssub.s32 %s1810_s25, %s2309_s14 }
  0x6c   : > { %1381 = dma.hbm_to_vmem [thread:$0]  (!%p1945_p6), %s2280_s6, 16, %s506_s13, [#allocation15]  }
  0x6d   : > { %p342_p6 = scmp.eq.s32.totalorder %s1928_s27, 1  ;;  %p61_p9 = scmp.eq.s32.totalorder %s58_s24, 0 }
  0x6e   : > { %p2030_p10 = por %p2256_p1, %p76_p8  ;;  %p2043_p13 = por %p348_p11, %p76_p8 }
  0x6f   : > { %p2034_p12 = por %p342_p6, %p70_p0  ;;  %p1402_p7 = scmp.lt.s32.totalorder %s1814_s26, 2 }
  0x70   : > { %s2041_s18 = scalar_select %p61_p9, %s1802_s23, %s63_s16  }
  0x71   : > { %s537_s29 = sand.u32 1, %s1802_s23   ;;  %s1266_s13 = sshll.u32 %s1810_s25, 6 }
  0x72   : > { %s1265_s15 = sshll.u32 %s537_s29, 2  ;;  %s2285_s0 = sld [smem:[#allocation28_spill]] }
  0x73   : > { %s541_s24 = scalar_lea.vmem [#allocation5], %s1265_s15  ;;  %p2055_p0 = pnand %p1402_p7, %p2019_p4 }
  0x74   : > { %s549_s2 = sshll.u32 %s541_s24, 4  ;;  %s538_s16 = scalar_lea.sflag [#allocation6], %s537_s29  ;;  %s550_s2 = int_to_ptr.vmem [resolvable:$true] %s549_s2 }
  0x75   : > { %p1640_p2 = pneg %p2055_p0  ;;  %s1651_s19 = scalar_lea.vmem %s550_s2, 64 }
  0x76   : > { %p1652_p8 = scmp.ne.s32.totalorder %s550_s2, %s1651_s19  ;;  %s1824_s4 = smov [#allocation5]  }
  0x77   : > { %s1656_s5 = sshll.u32 %s1824_s4, 4  ;;  %s1657_s5 = int_to_ptr.vmem [resolvable:$false] %s1656_s5 }
  0x78   : > { %s547_s30 = scalar_lea.hbm %s2285_s0, %s1266_s13  ;;  %p1654_p6 = pnand %p1652_p8, %p1640_p2 }
  0x79   : > { %s1658_s13 = scalar_lea.vmem %s1657_s5, 128  ;;  %p1659_p11 = scmp.lt.s32.totalorder %s550_s2, %s1657_s5 }
  0x7a   : > { %p1655_p9 = pneg %p1654_p6  ;;  %p1660_p5 = scmp.lt.s32.totalorder %s1658_s13, %s1651_s19 }
  0x7c   : > { %p1661_p1 = por %p1660_p5, %p1659_p11 }
  0x7e   : > { %p1662_p4 = pnand %p1661_p1, %p1655_p9 }
  0x80   : > { %1665 = shalt.err (!%p1662_p4)
}
  0x81   : > { %1385 = dma.hbm_to_vmem [thread:$0]  (!%p2055_p0), %s547_s30, 64, %s550_s2, %s538_s16  }
  0x82   : > { %558 = sbr.rel (%p1933_p3) target bundleno = 543 (0x21f), region = 60  ;;  %s2066_s10 = sand.u32 (!%p1933_p3), 1, %s1798_s22  }
  0x83   : > { %s2069_s4 = sshll.u32 (!%p1933_p3), %s2066_s10, 2  ;;  %s561_s5 = scalar_lea.sflag (!%p1933_p3), [#allocation6], %s2066_s10 }
  0x84   : > { %s564_s19 = scalar_lea.vmem (!%p1933_p3), [#allocation5], %s2069_s4 }
  0x87   : > { %1769 = dma.done.wait (%p2030_p10), %s561_s5, 64  }
  0x88   : > { %1771 = vsyncadd (%p2030_p10), %s561_s5, 4294967232  ;;  %p2287_p1 = scmp.eq.s32.totalorder %s1928_s27, 0 }
  0x8a   : > { %1773 = dma.done.wait (%p2287_p1), [#allocation9], 512   ;;  %p2288_p3 = pmov %p2287_p1 }
  0x8b   : > { %p2289_p5 = pmov %p2287_p1 }
  0x8c   : > { %1775 = vsyncadd (%p2288_p3), [#allocation9], 4294966784 }
  0x8d   : > { %1777 = dma.done.wait (%p2289_p5), [#allocation12], 272   ;;  %p2290_p7 = pmov %p2287_p1 }
  0x8e   : > { %p2291_p0 = pmov %p2287_p1 }
  0x8f   : > { %1779 = vsyncadd (%p2290_p7), [#allocation12], 4294967024 }
  0x90   : > { %1781 = dma.done.wait (%p2291_p0), [#allocation15], 32   ;;  %p2292_p2 = pmov %p2291_p0 }
  0x91   : > { %vm671_vm0 = vcmask 261120   ;;  %v1825_v0 = vmov 0.0   ;;  %vm1826_vm1 = vmmov 0   ;;  %v1470_v1 = vld [vmem:[#allocation8 + $0x8] sm:$0xff]   ;;  %v1471_v2 = vld [vmem:[#allocation10 + $0x8] sm:$0xff]   ;;  %v1472_v3 = vld [vmem:[#allocation8] sm:$0xff]  }
  0x92   : > { %1783 = vsyncadd (%p2292_p2), [#allocation15], 4294967264  ;;  %1307 = vmatprep.subr.bf16.mxu0 %v1825_v0  ;;  %1315 = vmatprep.subr.bf16.mxu1 %v1825_v0  ;;  %672 = vst.msk [vmem:[#allocation2] sm:$0xff] %vm671_vm0, %v1825_v0  ;;  %v1473_v4 = vld [vmem:[#allocation10] sm:$0xff]   ;;  %v675_v5 = vld [vmem:[%s564_s19] sm:$0xf] }
  0x93   : > { %673 = vst.msk [vmem:[#allocation3] sm:$0xff] %vm671_vm0, %v1825_v0  ;;  %674 = vst.msk [vmem:[#allocation4] sm:$0xff] %vm671_vm0, %v1825_v0  ;;  %1311 = vmatprep.mubr.msk.bf16.mxu0 %vm1826_vm1, %v1825_v0  ;;  %1319 = vmatprep.mubr.msk.bf16.mxu1 %vm1826_vm1, %v1825_v0  ;;  %v1474_v6 = vld [vmem:[#allocation11 + $0x8] sm:$0xff]   ;;  %v1475_v7 = vld [vmem:[#allocation11] sm:$0xff]   ;;  %s1827_s2 = smov 127   ;;  %s1828_s3 = smov 1  }
  0x94   : > { %1308 = vmatpush3.bf16.msra.mxu0 %v1470_v1  ;;  %1316 = vmatpush3.bf16.msra.mxu1 %v1471_v2  ;;  %v1287_v21 = vld [vmem:[#allocation13] ss:$0 sm:$0xff]  ;;  %v1288_v25 = vld [vmem:[#allocation14] ss:$0 sm:$0xff]  ;;  %v1289_v32 = vld [vmem:[#allocation16] ss:$0 sm:$0xff] }
  0x95   : > { %1309 = vmatprep.subr.bf16.mxu0 %v1825_v0  ;;  %1317 = vmatprep.subr.bf16.mxu1 %v1825_v0  ;;  %vm916_vm2 = vcmask 257024   ;;  %s650_s28 = scalar_lea.vmem [#allocation20], %s2069_s4  ;;  %s2293_s7 = sld [smem:[#allocation35_spill]]  ;;  %v864_v38 = vld [vmem:[%s2248_s9] sm:$0xf]  ;;  %vm893_vm3 = vcmask 252928  }
  0x96   : > { %s2294_s8 = sld [smem:[#allocation36_spill]]  ;;  %vm888_vm4 = vcmask 7168   ;;  %v865_v41 = vunpack.c.l.bf16 %v864_v38  ;;  %s636_s5 = scalar_lea.vmem [#allocation17], %s2069_s4 }
  0x97   : > { %s2295_s24 = sld [smem:[#allocation27_spill]]  ;;  %s956_s19 = sshll.u32 %s636_s5, 4  ;;  %s2127_s19 = int_to_ptr.vmem [resolvable:$true] %s956_s19 }
  0x98   : > { %1310 = vmatpush3.bf16.msra.mxu0 %v1472_v3  ;;  %1318 = vmatpush3.bf16.msra.mxu1 %v1473_v4  ;;  %s984_s17 = sshll.u32 %s650_s28, 4  ;;  %s2296_s11 = sld [smem:[#allocation37_spill]]  ;;  %s2142_s17 = int_to_ptr.vmem [resolvable:$true] %s984_s17 }
  0x99   : > { %1323 = vmatprep.subr.bf16.mxu0 %v1825_v0  ;;  %v676_v8 = vld [vmem:[#allocation2] sm:$0xff]  ;;  %s2297_s16 = sld [smem:[#allocation38_spill]]  ;;  %s932_s6 = scalar_lea.sflag [#allocation7], %s2066_s10 }
  0x9a   : > { %v739_v9 = vld [vmem:[#allocation3] sm:$0xff]  ;;  %v798_v19 = vld [vmem:[#allocation4] sm:$0xff]  ;;  %s2298_s29 = sld [smem:[#allocation39_spill]]  ;;  %s1829_s30 = smov [#allocation17]  }
  0x9b   : > { %1312 = vmatmul.mubr.msk.bf16.vlgmr.msra.gmra.mxu0 %vm671_vm0, %v675_v5  ;;  %1320 = vmatmul.mubr.msk.bf16.vlgmr.msra.gmra.mxu1 %vm671_vm0, %v675_v5  ;;  %v860_v36 = vld [vmem:[%s2293_s7] sm:$0xf]  ;;  %s1666_s7 = scalar_lea.vmem %s2127_s19, 64 }
  0x9c   : > { %1324 = vmatpush3.bf16.msra.mxu0 %v1474_v6  ;;  %1327 = vmatprep.mubr.msk.bf16.mxu0 %vm1826_vm1, %v1825_v0  ;;  %v862_v37 = vld [vmem:[%s2294_s8] sm:$0xf]  ;;  %v861_v39 = vunpack.c.l.bf16 %v860_v36  ;;  %p1667_p10 = scmp.ne.s32.totalorder %s2127_s19, %s1666_s7 }
  0x9d   : > { %1325 = vmatprep.subr.bf16.mxu0 %v1825_v0  ;;  %v863_v40 = vunpack.c.l.bf16 %v862_v37  ;;  %s1293_s13 = sshll.u32 %s2295_s24, 6  ;;  %s1670_s24 = sshll.u32 %s1829_s30, 4  ;;  %s1671_s24 = int_to_ptr.vmem [resolvable:$false] %s1670_s24 }
  0x9e   : > { %s2125_s20 = scalar_lea.hbm %s2296_s11, %s1293_s13  ;;  %p1668_p8 = pnand %p1667_p10, %p2034_p12 }
  0x9f   : > { %s2132_s0 = scalar_lea.hbm %s2297_s16, %s1293_s13  ;;  %s1672_s8 = scalar_lea.vmem %s1671_s24, 128 }
  0xa0   : > { %1326 = vmatpush3.bf16.msra.mxu0 %v1475_v7  ;;  %s2140_s15 = scalar_lea.hbm %s2298_s29, %s1293_s13  ;;  %p1669_p6 = pneg %p1668_p8 }
  0xa1   : > { %p1673_p9 = scmp.lt.s32.totalorder %s2127_s19, %s1671_s24  ;;  %p1674_p11 = scmp.lt.s32.totalorder %s1672_s8, %s1666_s7 }
  0xa3   : > { %1328 = vmatmul.mubr.msk.bf16.vlgmr.msra.gmra.mxu0 %vm671_vm0, %v675_v5  ;;  %p1675_p4 = por %p1674_p11, %p1673_p9 }
  0xa5   : > { %p1676_p1 = pnand %p1675_p4, %p1669_p6 }
 0x15b   : > { %v731_v10 = vpop.f32.mrf.mxu0  ;;  %v790_v12 = vpop.f32.mrf.mxu1 }
 0x15c   : > { %v737_v11 = vadd.f32 %v731_v10, %v676_v8  ;;  %v796_v13 = vadd.f32 %v790_v12, %v739_v9 }
 0x15d   : > { %v1313_v14 = vpop.f32.mrf.mxu0  ;;  %v1321_v15 = vpop.f32.mrf.mxu1 }
 0x15e   : > { %738 = vst.msk [vmem:[#allocation2] sm:$0xff] %vm671_vm0, %v737_v11  ;;  %797 = vst.msk [vmem:[#allocation3] sm:$0xff] %vm671_vm0, %v796_v13 }
 0x15f   : > { %v734_v16 = vpop.f32.mrf.mxu0  ;;  %v793_v17 = vpop.f32.mrf.mxu1 }
 0x161   : > { %v1314_v18 = vpop.f32.mrf.mxu0  ;;  %v1322_v20 = vpop.f32.mrf.mxu1 }
 0x163   : > { %v849_v22 = vpop.f32.mrf.mxu0 }
 0x164   : > { %v855_v23 = vadd.f32 %v849_v22, %v798_v19 }
 0x165   : > { %v866_v24 = vld [vmem:[#allocation2] sm:$0xff]  ;;  %v1329_v26 = vpop.f32.mrf.mxu0  ;;  %v875_v28 = vld [vmem:[#allocation3] sm:$0xff] }
 0x166   : > { %v874_v27 = vadd.f32 %v1287_v21, %v866_v24  ;;  %856 = vst.msk [vmem:[#allocation4] sm:$0xff] %vm671_vm0, %v855_v23  ;;  %v883_v30 = vadd.f32 %v1288_v25, %v875_v28 }
 0x167   : > { %v852_v29 = vpop.f32.mrf.mxu0 }
 0x168   : > { %890 = vrot.lane.b32.xlu1 %v874_v27, %s1827_s2  ;;  %885 = vrot.lane.b32.xlu0 %v874_v27, %s1828_s3  ;;  %v895_v46 = vmul.f32 %v874_v27, %v861_v39  ;;  %v910_v55 = vmul.f32 %v883_v30, %v861_v39 }
 0x169   : > { %v1330_v31 = vpop.f32.mrf.mxu0 }
 0x16c   : > { %906 = vrot.lane.b32.xlu1 %v883_v30, %s1827_s2  ;;  %902 = vrot.lane.b32.xlu0 %v883_v30, %s1828_s3  ;;  %s2257_s2 = scalar_lea.vmem [#allocation18], %s2069_s4 }
 0x16d   : > { %v920_v33 = vld [vmem:[#allocation4] sm:$0xff]  ;;  %s970_s3 = sshll.u32 %s2257_s2, 4  ;;  %s2134_s3 = int_to_ptr.vmem [resolvable:$true] %s970_s3 }
 0x16e   : > { %v928_v34 = vadd.f32 %v1289_v32, %v920_v33 }
 0x170   : > { %v929_v35 = vpack.c.bf16 %v928_v34, %v928_v34 }
 0x172   : > { %930 = vst.msk [vmem:[%s650_s28] sm:$0xf] %vm916_vm2, %v929_v35 }
 0x1da   : > { %v891_v42 = vpop.permute.xlu1 %890  ;;  %v886_v43 = vpop.permute.xlu0 %885 }
 0x1db   : > { %v894_v44 = vsel %vm893_vm3, %v891_v42, 0.0  ;;  %v889_v45 = vsel %vm888_vm4, 0.0, %v886_v43 }
 0x1dc   : > { %v896_v47 = vmul.f32 %v889_v45, %v863_v40  ;;  %v898_v48 = vmul.f32 %v894_v44, %v865_v41 }
 0x1de   : > { %v897_v49 = vadd.f32 %v896_v47, %v895_v46  ;;  %v907_v50 = vpop.permute.xlu1 %906  ;;  %v903_v51 = vpop.permute.xlu0 %902 }
 0x1df   : > { %v909_v52 = vsel %vm893_vm3, %v907_v50, 0.0  ;;  %v905_v53 = vsel %vm888_vm4, 0.0, %v903_v51 }
 0x1e0   : > { %v899_v54 = vadd.f32 %v898_v48, %v897_v49  ;;  %v911_v56 = vmul.f32 %v905_v53, %v863_v40  ;;  %v913_v58 = vmul.f32 %v909_v52, %v865_v41 }
 0x1e2   : > { %v900_v57 = vmul.f32 0.25, %v899_v54  ;;  %v912_v59 = vadd.f32 %v911_v56, %v910_v55 }
 0x1e4   : > { %v915_v60 = vpack.c.bf16 %v900_v57, %v900_v57  ;;  %v914_v61 = vadd.f32 %v913_v58, %v912_v59 }
 0x1e6   : > { %v918_v62 = vpack.c.bf16 %v914_v61, %v914_v61  ;;  %917 = vst.msk [vmem:[%s636_s5] sm:$0xf] %vm916_vm2, %v915_v60 }
 0x1e7   : > { %1679 = shalt.err (!%p1676_p1)
}
 0x1e8   : > { %s1680_s13 = scalar_lea.hbm %s2125_s20, 64  ;;  %s1684_s2 = scalar_lea.hbm %s2296_s11, 128 }
 0x1e9   : > { %p1681_p3 = scmp.ne.s32.totalorder %s2125_s20, %s1680_s13  ;;  %p1685_p0 = scmp.lt.s32.totalorder %s2125_s20, %s2296_s11 }
 0x1ea   : > { %p1686_p2 = scmp.lt.s32.totalorder %s1684_s2, %s1680_s13 }
 0x1eb   : > { %p1682_p5 = pnand %p1681_p3, %p2034_p12 }
 0x1ec   : > { %p1687_p10 = por %p1686_p2, %p1685_p0 }
 0x1ed   : > { %p1683_p7 = pneg %p1682_p5 }
 0x1ef   : > { %p1688_p8 = pnand %p1687_p10, %p1683_p7 }
 0x1f1   : > { %1691 = shalt.err (!%p1688_p8)
}
 0x1f2   : > { %1357 = dma.vmem_to_hbm [thread:$0]  (%p2034_p12), %s2127_s19, 64, %s2125_s20, %s932_s6  }
 0x1f3   : > { %s2299_s7 = scalar_lea.vmem [#allocation18], %s2069_s4  ;;  %s2300_s8 = sand.u32 1, %s1928_s27  }
 0x1f4   : > { %919 = vst.msk [vmem:[%s2299_s7] sm:$0xf] %vm916_vm2, %v918_v62  ;;  %s2170_s24 = scalar_lea.sflag [#allocation19], %s2300_s8  ;;  %s1692_s13 = scalar_lea.vmem %s2134_s3, 64 }
 0x1f5   : > { %p1693_p6 = scmp.ne.s32.totalorder %s2134_s3, %s1692_s13  ;;  %s1830_s10 = smov [#allocation18]  }
 0x1f6   : > { %s1696_s5 = sshll.u32 %s1830_s10, 4  ;;  %s1697_s5 = int_to_ptr.vmem [resolvable:$false] %s1696_s5 }
 0x1f7   : > { %p1694_p9 = pnand %p1693_p6, %p2034_p12  ;;  %s1698_s2 = scalar_lea.vmem %s1697_s5, 128 }
 0x1f8   : > { %p1699_p4 = scmp.lt.s32.totalorder %s2134_s3, %s1697_s5  ;;  %p1700_p1 = scmp.lt.s32.totalorder %s1698_s2, %s1692_s13 }
 0x1f9   : > { %p1695_p11 = pneg %p1694_p9 }
 0x1fa   : > { %p1701_p3 = por %p1700_p1, %p1699_p4 }
 0x1fc   : > { %p1702_p5 = pnand %p1701_p3, %p1695_p11 }
 0x1fe   : > { %1705 = shalt.err (!%p1702_p5)
}
 0x1ff   : > { %s1706_s6 = scalar_lea.hbm %s2132_s0, 64  ;;  %s1710_s19 = scalar_lea.hbm %s2297_s16, 128 }
 0x200   : > { %p1707_p7 = scmp.ne.s32.totalorder %s2132_s0, %s1706_s6  ;;  %p1711_p10 = scmp.lt.s32.totalorder %s2132_s0, %s2297_s16 }
 0x201   : > { %p1712_p8 = scmp.lt.s32.totalorder %s1710_s19, %s1706_s6 }
 0x202   : > { %p1708_p0 = pnand %p1707_p7, %p2034_p12 }
 0x203   : > { %p1713_p6 = por %p1712_p8, %p1711_p10 }
 0x204   : > { %p1709_p2 = pneg %p1708_p0 }
 0x206   : > { %p1714_p9 = pnand %p1713_p6, %p1709_p2 }
 0x208   : > { %1717 = shalt.err (!%p1714_p9)
}
 0x209   : > { %1358 = dma.vmem_to_hbm [thread:$0]  (%p2034_p12), %s2134_s3, 64, %s2132_s0, %s2170_s24  }
 0x20a   : > { %s1718_s30 = scalar_lea.vmem %s2142_s17, 64  ;;  %s1831_s7 = smov [#allocation20]  }
 0x20b   : > { %p1719_p11 = scmp.ne.s32.totalorder %s2142_s17, %s1718_s30  ;;  %s1722_s8 = sshll.u32 %s1831_s7, 4  ;;  %s1723_s8 = int_to_ptr.vmem [resolvable:$false] %s1722_s8 }
 0x20c   : > { %s1724_s13 = scalar_lea.vmem %s1723_s8, 128  ;;  %p1725_p3 = scmp.lt.s32.totalorder %s2142_s17, %s1723_s8 }
 0x20d   : > { %p1720_p4 = pnand %p1719_p11, %p2034_p12  ;;  %p1726_p5 = scmp.lt.s32.totalorder %s1724_s13, %s1718_s30 }
 0x20f   : > { %p1721_p1 = pneg %p1720_p4  ;;  %p1727_p7 = por %p1726_p5, %p1725_p3 }
 0x211   : > { %p1728_p0 = pnand %p1727_p7, %p1721_p1 }
 0x213   : > { %1731 = shalt.err (!%p1728_p0)
}
 0x214   : > { %s1732_s10 = scalar_lea.hbm %s2140_s15, 64  ;;  %s1736_s5 = scalar_lea.hbm %s2298_s29, 128 }
 0x215   : > { %p1733_p2 = scmp.ne.s32.totalorder %s2140_s15, %s1732_s10  ;;  %p1737_p6 = scmp.lt.s32.totalorder %s2140_s15, %s2298_s29 }
 0x216   : > { %p1738_p9 = scmp.lt.s32.totalorder %s1736_s5, %s1732_s10 }
 0x217   : > { %p1734_p10 = pnand %p1733_p2, %p2034_p12 }
 0x218   : > { %p1739_p11 = por %p1738_p9, %p1737_p6 }
 0x219   : > { %p1735_p8 = pneg %p1734_p10 }
 0x21b   : > { %p1740_p4 = pnand %p1739_p11, %p1735_p8 }
 0x21d   : > { %1743 = shalt.err (!%p1740_p4)
}
 0x21e   : > { %1359 = dma.vmem_to_hbm [thread:$0]  (%p2034_p12), %s2142_s17, 64, %s2140_s15, %s2170_s24  }
 0x21f PF: > { %s996_s27 = sand.u32 1, %s1794_s21   ;;  %p2301_p1 = scmp.ge.s32.totalorder %s1814_s26, 2 }
 0x220   : > { %s997_s4 = scalar_lea.sflag [#allocation7], %s996_s27 }
 0x221   : > { %p1387_p3 = pnand %p2301_p1, %p2043_p13 }
 0x223   : > { %p1388_p5 = pneg %p1387_p3 }
 0x225   : > { %1785 = dma.done.wait (%p1388_p5), %s997_s4, 64  }
 0x226   : > { %1787 = vsyncadd (%p1388_p5), %s997_s4, 4294967232  ;;  %s2302_s19 = sadd.s32 4294967294, %s1814_s26  }
 0x227   : > { %s1005_s20 = sand.u32 1, %s2302_s19  }
 0x228   : > { %s1006_s12 = scalar_lea.sflag [#allocation19], %s1005_s20 }
 0x229   : > { %1789 = dma.done.wait (%p1388_p5), %s1006_s12, 128  }
 0x22a   : > { %1791 = vsyncadd (%p1388_p5), %s1006_s12, 4294967168  ;;  %s35_s26 = sadd.s32 1, %s1814_s26   ;;  %s2303_s21 = smov %s1798_s22 }
 0x22b   : > { %p32_p12 = scmp.ge.s32.totalorder %s35_s26, 4   ;;  %s2304_s22 = smov %s1802_s23 }
 0x22c   : > { %s2305_s23 = smov %s2041_s18  ;;  %s2306_s24 = smov %s1810_s25 }
 0x22d   : > { %s2307_s25 = smov %s2309_s14  ;;  %34 = sbr.rel (!%p32_p12) target bundleno = 24 (0x18), region = 184 }
 0x232   :  { %1020 = vsyncpa [#allocation6], 1 }
 0x233   :  { %1022 = vsyncpa [#allocation6 + $0x1], 1 }
 0x234   :  { %1023 = vsyncpa [#allocation9], 1 }
 0x235   :  { %1024 = vsyncpa [#allocation12], 1 }
 0x236   :  { %1025 = vsyncpa [#allocation15], 1 }
 0x237   :  { %1026 = vsyncpa [#allocation7], 1 }
 0x238   :  { %1028 = vsyncpa [#allocation7 + $0x1], 1 }
 0x239   :  { %1029 = vsyncpa [#allocation19], 1 }
 0x23a   :  { %1031 = vsyncpa [#allocation19 + $0x1], 1 }

</bundles_post_ra>
